<compile_context>
chip_gen: v7x
topology: tpu7x:2x2x1
jax: 0.10.0
libtpu: 0.0.40
codegen_flags: <defaults>
</compile_context>

<pallas_src>
import functools

import jax
import jax.numpy as jnp
from jax.experimental import pallas as pl
from jax.experimental.pallas import tpu as pltpu


def _round_up(x, m):
    return ((x + m - 1) // m) * m


def _cdiv(a, b):
    return -(-a // b)


def _patch_embed_kernel(x_ref, w_ref, b_ref, o_ref):
    # x_ref: (TM, Kp), w_ref: (Kp, Ep), b_ref: (1, Ep), o_ref: (TM, Ep)
    acc = jnp.dot(x_ref[...], w_ref[...], preferred_element_type=jnp.float32)
    o_ref[...] = (acc + b_ref[...].astype(jnp.float32)).astype(o_ref.dtype)


def _resident_spec(block_shape, index_map):
    """BlockSpec for an operand fetched once (constant index_map).

    Single-buffer it (pipeline_mode=pl.Buffered(1)) when the API is available:
    double-buffering a block that is DMA'd exactly once just wastes VMEM
    (important under v7x's 64 MiB VMEM). Falls back to the default spec if the
    running jax version lacks pipeline_mode / pl.Buffered.
    """
    try:
        return pl.BlockSpec(block_shape, index_map, pipeline_mode=pl.Buffered(1))
    except (TypeError, AttributeError):
        return pl.BlockSpec(block_shape, index_map)


def patch_embedding_forward(x, weight, bias, patch_size, *, tm=512,
                            compute_dtype=jnp.bfloat16, out_dtype=None):
    """x: (B, C, H, W) NCHW; weight: (E, C, P, P) OIHW; bias: (E,).

    Returns (B, num_patches, E), matching PyTorch's
    Conv2d(kernel=P, stride=P) + Rearrange('b c h w -> b (h w) c').

    tm:            row-tile target (sweep 512-1024 on big parts).
    compute_dtype: MXU input dtype (default bf16; f32 accumulation always).
    out_dtype:     output dtype (default x.dtype); pass bf16 to halve output
                   HBM traffic if the consumer accepts it.
    """
    B, C, H, W = x.shape
    E = weight.shape[0]
    P = patch_size
    Hp, Wp = H // P, W // P
    N = Hp * Wp
    K = C * P * P
    M = B * N

    cdt = jnp.dtype(compute_dtype) if compute_dtype is not None else jnp.dtype(x.dtype)
    odt = jnp.dtype(out_dtype) if out_dtype is not None else jnp.dtype(x.dtype)

    # Lane-dense padding: contraction (K) and embedding (E) dims rounded up to
    # multiples of 128 so loads/stores are unmasked full vregs.
    Kp = _round_up(K, 128)
    Ep = _round_up(E, 128)

    # Row tile:
    #  * target `tm` (default 512),
    #  * multiple of the dtype sublane pack (8 f32 / 16 bf16 / 32 int8-fp8),
    #  * balanced so the 1-D "parallel" grid has >= 2 steps (v7x has 2 TCs),
    #  * M padded up to a whole number of tiles -> unmasked trailing stores.
    sub = {4: 8, 2: 16, 1: 32}.get(cdt.itemsize, 8)
    tm_bal = _round_up(_cdiv(M, 2), sub)            # ~half of M, sublane-aligned
    TM = max(sub, min(_round_up(tm, sub), tm_bal))
    Mp = _round_up(M, TM)
    grid_m = Mp // TM

    # --- layout glue (plain JAX) ---
    # Cast to the MXU compute dtype BEFORE the patch transpose: if XLA does not
    # fuse the transpose into the pallas_call input DMA, the materialized patch
    # matrix then costs half the HBM traffic (bf16 vs f32).
    # (B, C, Hp, P, Wp, P) -> (B, Hp, Wp, C, P, P) -> (B*N, K); each patch is
    # flattened in (c, i, j) order, matching the OIHW conv-weight reshape.
    # TODO(synk): for large images, gather patches in-kernel from raw NCHW x
    # (BlockSpec over (1, C, P, W)) to remove the HBM round-trip entirely; not
    # done here because small P/W blocks violate the (8,128) block-tile rule.
    xc = x if cdt == jnp.dtype(x.dtype) else x.astype(cdt)
    x_patches = (
        xc.reshape(B, C, Hp, P, Wp, P)
        .transpose(0, 2, 4, 1, 3, 5)
        .reshape(M, K)
    )
    w_mat = weight.astype(cdt).reshape(E, K).T        # (K, E)
    b_row = bias.astype(jnp.float32).reshape(1, E)    # (1, E), f32 bias add

    pad_m, pad_k, pad_e = Mp - M, Kp - K, Ep - E
    if pad_m or pad_k:
        x_patches = jnp.pad(x_patches, ((0, pad_m), (0, pad_k)))
    if pad_k or pad_e:
        w_mat = jnp.pad(w_mat, ((0, pad_k), (0, pad_e)))
    if pad_e:
        b_row = jnp.pad(b_row, ((0, 0), (0, pad_e)))

    out_flat = pl.pallas_call(
        _patch_embed_kernel,
        out_shape=jax.ShapeDtypeStruct((Mp, Ep), odt),
        grid_spec=pltpu.PrefetchScalarGridSpec(
            num_scalar_prefetch=0,
            grid=(grid_m,),
            in_specs=[
                pl.BlockSpec((TM, Kp), lambda i: (i, 0)),    # patch-row tile
                _resident_spec((Kp, Ep), lambda i: (0, 0)),  # weight, resident
                _resident_spec((1, Ep), lambda i: (0, 0)),   # bias, resident
            ],
            out_specs=pl.BlockSpec((TM, Ep), lambda i: (i, 0)),
        ),
        compiler_params=pltpu.CompilerParams(
            dimension_semantics=("parallel",),
            # Let XLA fuse the patch reshape/transpose/cast/pad (producer of
            # input 0) into the kernel's input pipeline instead of writing the
            # patch matrix back to HBM first.
            allow_input_fusion=[True, False, False],
        ),
    )(x_patches, w_mat, b_row)

    return out_flat[:M, :E].reshape(B, N, E)


def _reference(x, weight, bias, patch_size):
    """Pure-JAX reference: conv2d stride=kernel=P (NCHW) + rearrange."""
    out = jax.lax.conv_general_dilated(
        x, weight,
        window_strides=(patch_size, patch_size),
        padding="VALID",
        dimension_numbers=("NCHW", "OIHW", "NCHW"),
    ) + bias.reshape(1, -1, 1, 1)
    B, E, Hp, Wp = out.shape
    return out.transpose(0, 2, 3, 1).reshape(B, Hp * Wp, E)


if __name__ == "__main__":
    # Small shapes consistent with the module: image 16x16, patch 4, C=3, E=32.
    B, C, IMG, P, E = 2, 3, 16, 4, 32

    key = jax.random.PRNGKey(0)
    kx, kw, kb = jax.random.split(key, 3)
    x = jax.random.normal(kx, (B, C, IMG, IMG), dtype=jnp.float32)
    weight = jax.random.normal(kw, (E, C, P, P), dtype=jnp.float32) * 0.02
    bias = jax.random.normal(kb, (E,), dtype=jnp.float32) * 0.02

    ref = _reference(x, weight, bias, P)

    # Default (bf16 MXU compute, f32 accumulation, f32 output): loose tolerance.
    fwd_bf16 = jax.jit(functools.partial(patch_embedding_forward, patch_size=P))
    out_bf16 = jax.block_until_ready(fwd_bf16(x, weight, bias))
    assert out_bf16.shape == (B, (IMG // P) ** 2, E), out_bf16.shape
    assert jnp.allclose(out_bf16, ref, atol=2e-2, rtol=2e-2), float(
        jnp.max(jnp.abs(out_bf16 - ref)))

    # Full-f32 compute path: tight tolerance.
    fwd_f32 = jax.jit(functools.partial(
        patch_embedding_forward, patch_size=P, compute_dtype=None))
    out_f32 = jax.block_until_ready(fwd_f32(x, weight, bias))
    assert jnp.allclose(out_f32, ref, atol=1e-4, rtol=1e-4), float(
        jnp.max(jnp.abs(out_f32 - ref)))

    print("KERNEL_OK")
</pallas_src>

<mosaic_0001>
module attributes {stable_mosaic.version = 11 : i64} {
  func.func @_patch_embed_kernel(%arg0: i32, %arg1: memref<16x128xbf16, #tpu.memory_space<vmem>>, %arg2: memref<128x128xbf16, #tpu.memory_space<vmem>>, %arg3: memref<1x128xf32, #tpu.memory_space<vmem>>, %arg4: memref<16x128xf32, #tpu.memory_space<vmem>>) attributes {dimension_semantics = [#tpu.dimension_semantics<parallel>], iteration_bounds = array<i64: 2>, scalar_prefetch = 0 : i64, scratch_operands = 0 : i64, tpu.core_type = #tpu.core_type<tc>, window_params = [{transform_indices = @transform_0, window_bounds = array<i64: 16, 128>}, {pipeline_mode = #tpu.pipeline_mode<synchronous>, transform_indices = @transform_1, window_bounds = array<i64: 128, 128>}, {pipeline_mode = #tpu.pipeline_mode<synchronous>, transform_indices = @transform_2, window_bounds = array<i64: 1, 128>}, {transform_indices = @transform_3, window_bounds = array<i64: 16, 128>}]} {
    %c0 = arith.constant 0 : index
    %c0_0 = arith.constant 0 : index
    %0 = vector.load %arg1[%c0, %c0_0] : memref<16x128xbf16, #tpu.memory_space<vmem>>, vector<16x128xbf16>
    %c0_1 = arith.constant 0 : index
    %c0_2 = arith.constant 0 : index
    %1 = vector.load %arg2[%c0_1, %c0_2] : memref<128x128xbf16, #tpu.memory_space<vmem>>, vector<128x128xbf16>
    %cst = arith.constant dense<0.000000e+00> : vector<16x128xf32>
    %2 = tpu.matmul %0, %1, %cst {dimension_numbers = #tpu.dot_dimension_numbers<[1], [0], [0], [1], [0, 0, 1, 1], [], []>} : vector<16x128xbf16>, vector<128x128xbf16>, vector<16x128xf32> -> vector<16x128xf32>
    %c0_3 = arith.constant 0 : index
    %c0_4 = arith.constant 0 : index
    %3 = vector.load %arg3[%c0_3, %c0_4] : memref<1x128xf32, #tpu.memory_space<vmem>>, vector<1x128xf32>
    %4 = vector.broadcast %3 : vector<1x128xf32> to vector<16x128xf32>
    %5 = arith.addf %2, %4 : vector<16x128xf32>
    %c0_5 = arith.constant 0 : index
    %c0_6 = arith.constant 0 : index
    %6 = vector.load %arg4[%c0_5, %c0_6] : memref<16x128xf32, #tpu.memory_space<vmem>>, vector<16x128xf32>
    tpu.vector_store %arg4[%c0_5, %c0_6], %5 {strides = array<i32>} : memref<16x128xf32, #tpu.memory_space<vmem>>, vector<16x128xf32>,
    return
  }
  func.func @transform_0(%arg0: i32) -> (i32, i32) {
    %c0_i32 = arith.constant 0 : i32
    %c0_i32_0 = arith.constant 0 : i32
    return %arg0, %c0_i32 : i32, i32
  }
  func.func @transform_1(%arg0: i32) -> (i32, i32) {
    %c0_i32 = arith.constant 0 : i32
    %c0_i32_0 = arith.constant 0 : i32
    %c0_i32_1 = arith.constant 0 : i32
    return %c0_i32, %c0_i32_0 : i32, i32
  }
  func.func @transform_2(%arg0: i32) -> (i32, i32) {
    %c0_i32 = arith.constant 0 : i32
    %c0_i32_0 = arith.constant 0 : i32
    %c0_i32_1 = arith.constant 0 : i32
    return %c0_i32, %c0_i32_0 : i32, i32
  }
  func.func @transform_3(%arg0: i32) -> (i32, i32) {
    %c0_i32 = arith.constant 0 : i32
    %c0_i32_0 = arith.constant 0 : i32
    return %arg0, %c0_i32 : i32, i32
  }
}

</mosaic_0001>

<bundles_post_ra>
// kernel: patch_embedding_forward.2
= control target key start
LH: loop header
LB: loop body
LE: loop exit
PB: predicated region body
PF: predicated region fallthrough
CT: control target
= control target key end

     0   :  { %s754_s0 = inlined_call_operand.vmem [shape: bf16[128,128], index: 0, kind: input, shape index: {}]   ;;  %s755_s1 = inlined_call_operand.vmem [shape: f32[1,128], index: 1, kind: input, shape index: {}]   ;;  %s756_s2 = inlined_call_operand.vmem [shape: bf16[32,48], index: 2, kind: input, shape index: {}]   ;;  %s757_s3 = inlined_call_operand.<no memory space> [shape: bf16[], index: 3, kind: input, shape index: {}]   ;;  %s758_s4 = inlined_call_operand.hbm [shape: f32[32,128], index: 4, kind: output, shape index: {}]  }
   0x1   :  { %v9_v0 = vstv %s757_s3 }
   0x2   :  { %v621_v1 = vunpack.i.l.bf16 %v9_v0 }
   0x3   :  { %14 = vsyncpa [#allocation8], 0 }
   0x4   :  { %16 = vsyncpa [#allocation8 + $0x1], 0  ;;  %s623_s17 = smov 0   ;;  %s625_s18 = smov 0  }
   0x5   :  { %s627_s19 = smov 0   ;;  %s629_s20 = smov 0  }
   0x6 LB: > { %s644_s3 = sadd.s32 4294967295, %s586_s20   ;;  %s419_s21 = sadd.s32 4294967294, %s586_s20   ;;  %s586_s20 = sphi %s629_s20, %s764_s20   ;;  %s582_s19 = sphi %s627_s19, %s763_s19   ;;  %s578_s18 = sphi %s625_s18, %s762_s18   ;;  %s574_s17 = sphi %s623_s17, %s761_s17  }
   0x7   : > { %s648_s22 = sadd.s32 1, %s586_s20   ;;  %s97_s23 = sadd.s32 1, %s582_s19 }
   0x8   : > { %s94_s24 = ssub.s32 %s586_s20, %s648_s22  ;;  %p107_p0 = scmp.ne.s32.totalorder %s582_s19, %s578_s18 }
   0x9   : > { %p95_p1 = scmp.eq.s32.totalorder %s94_s24, 0  ;;  %p108_p2 = scmp.eq.s32.totalorder %s644_s3, 1 }
   0xa   : > { %p113_p3 = scmp.ne.s32.totalorder %s578_s18, %s574_s17  ;;  %p114_p4 = scmp.eq.s32.totalorder %s419_s21, 1 }
   0xb   : > { %s659_s25 = scalar_select %p95_p1, %s582_s19, %s97_s23  }
   0xc   : > { %p661_p5 = por %p108_p2, %p107_p0  ;;  %p665_p6 = por %p114_p4, %p113_p3 }
   0xd   : > { %p422_p7 = scmp.ge.s32.totalorder %s586_s20, 1  ;;  %p147_p8 = scmp.lt.s32.totalorder %s586_s20, 3 }
   0xf   : > { %p148_p9 = pnand %p422_p7, %p147_p8 }
  0x11   : > { %151 = sbr.rel (%p148_p9) target bundleno = 288 (0x120), region = 32 }
  0x18   : > { %v515_v2 = vld [vmem:[%s754_s0] sm:$0xff]   ;;  %v588_v3 = vmov 0.0   ;;  %v190_v4 = vlaneseq  ;;  %v516_v5 = vld [vmem:[%s754_s0 + $0x8] sm:$0xff]   ;;  %vm589_vm0 = vmmov 0   ;;  %s424_s6 = sshll.u32 %s644_s3, 1  ;;  %v517_v7 = vld [vmem:[%s754_s0 + $0x10] sm:$0xff]  }
  0x19   : > { %452 = vmatprep.subr.bf16.mxu0 %v588_v3  ;;  %468 = vmatprep.mubr.msk.bf16.mxu0 %vm589_vm0, %v588_v3  ;;  %p172_p10 = scmp.lt.s32.totalorder %s424_s6, 3  ;;  %v518_v9 = vld [vmem:[%s754_s0 + $0x18] sm:$0xff]   ;;  %v519_v16 = vld [vmem:[%s754_s0 + $0x20] sm:$0xff]   ;;  %v520_v17 = vld [vmem:[%s754_s0 + $0x28] sm:$0xff]   ;;  %s168_s5 = sand.u32 1, %s578_s18  }
  0x1a   : > { %453 = vmatpush3.bf16.msra.mxu0 %v515_v2  ;;  %v191_v6 = vand.u32 127, %v190_v4  ;;  %v521_v18 = vld [vmem:[%s754_s0 + $0x30] sm:$0xff]   ;;  %v522_v19 = vld [vmem:[%s754_s0 + $0x38] sm:$0xff]   ;;  %v427_v21 = vld [vmem:[%s755_s1] ss:$0 sm:$0xff]  ;;  %s442_s11 = sshll.u32 %s644_s3, 8 }
  0x1b   : > { %454 = vmatprep.subr.bf16.mxu0 %v588_v3  ;;  %s766_s6 = smov (!%p172_p10, %s424_s6), 3  ;;  %s711_s14 = scalar_lea.hbm %s758_s4, %s442_s11 }
  0x1c   : > { %s425_s9 = sshll.u32 %s766_s6, 2  ;;  %vm193_vm1 = vcmp.lt.s32.totalorder %v191_v6, 48  ;;  %s423_s6 = sshll.u32 %s168_s5, 4 }
  0x1d   : > { %s175_s12 = scalar_lea.vmem %s756_s2, %s425_s9  ;;  %s170_s9 = scalar_lea.vmem [#allocation7], %s423_s6 }
  0x1e   : > { %455 = vmatpush3.bf16.msra.mxu0 %v516_v5  ;;  %v187_v8 = vld [vmem:[%s175_s12] sm:$0xff]   ;;  %s357_s10 = sshll.u32 %s170_s9, 4  ;;  %s713_s15 = scalar_lea.sflag [#allocation8], %s168_s5  ;;  %s706_s10 = int_to_ptr.vmem [resolvable:$true] %s357_s10 }
  0x1f   : > { %456 = vmatprep.subr.bf16.mxu0 %v588_v3  ;;  %v188_v10 = vunpack.c.l.bf16 %v187_v8  ;;  %v209_v11 = vunpack.c.h.bf16 %v187_v8  ;;  %s524_s3 = scalar_lea.vmem %s706_s10, 256  ;;  %s590_s16 = smov [#allocation7]  }
  0x20   : > { %p525_p11 = scmp.ne.s32.totalorder %s706_s10, %s524_s3  ;;  %s528_s21 = sshll.u32 %s590_s16, 4  ;;  %s529_s21 = int_to_ptr.vmem [resolvable:$false] %s528_s21 }
  0x21   : > { %v194_v12 = vsel %vm193_vm1, %v188_v10, %v621_v1  ;;  %v215_v13 = vsel %vm193_vm1, %v209_v11, %v621_v1  ;;  %s530_s23 = scalar_lea.vmem %s529_s21, 512  ;;  %p531_p0 = scmp.lt.s32.totalorder %s706_s10, %s529_s21 }
  0x22   : > { %457 = vmatpush3.bf16.msra.mxu0 %v517_v7  ;;  %v195_v14 = vpack.c.bf16 %v588_v3, %v194_v12  ;;  %v217_v15 = vpack.c.bf16 %v588_v3, %v215_v13  ;;  %p526_p12 = pnand %p525_p11, %p661_p5  ;;  %p532_p1 = scmp.lt.s32.totalorder %s530_s23, %s524_s3 }
  0x23   : > { %458 = vmatprep.subr.bf16.mxu0 %v588_v3 }
  0x24   : > { %197 = vst [vmem:[#allocation9] sm:$0xf] %v195_v14  ;;  %219 = vst [vmem:[#allocation9 + $0x4] sm:$0xf] %v217_v15  ;;  %p527_p13 = pneg %p526_p12  ;;  %p533_p2 = por %p532_p1, %p531_p0 }
  0x26   : > { %459 = vmatpush3.bf16.msra.mxu0 %v518_v9  ;;  %p534_p3 = pnand %p533_p2, %p527_p13 }
  0x27   : > { %460 = vmatprep.subr.bf16.mxu0 %v588_v3 }
  0x2a   : > { %461 = vmatpush3.bf16.msra.mxu0 %v519_v16 }
  0x2b   : > { %462 = vmatprep.subr.bf16.mxu0 %v588_v3  ;;  %v523_v20 = vld [vmem:[#allocation9] sm:$0xff]  }
  0x2e   : > { %463 = vmatpush3.bf16.msra.mxu0 %v520_v17 }
  0x2f   : > { %464 = vmatprep.subr.bf16.mxu0 %v588_v3 }
  0x32   : > { %465 = vmatpush3.bf16.msra.mxu0 %v521_v18 }
  0x33   : > { %466 = vmatprep.subr.bf16.mxu0 %v588_v3 }
  0x36   : > { %467 = vmatpush3.bf16.msra.mxu0 %v522_v19 }
  0x39   : > { %469 = vmatmul.mubr.bf16.vlgmr.msra.gmra.mrb[0].mxu0 %v523_v20 }
 0x10c   : > { %v334_v22 = vpop.f32.mrb[0].mxu0 }
 0x10d   : > { %v335_v23 = vadd.f32 %v427_v21, %v334_v22  ;;  %v470_v24 = vpop.f32.mrb[1].mxu0 }
 0x10e   : > { %v337_v25 = vpop.f32.mrb[2].mxu0 }
 0x10f   : > { %341 = vst [vmem:[%s170_s9] sm:$0xff] %v335_v23  ;;  %v338_v26 = vadd.f32 %v427_v21, %v337_v25  ;;  %v471_v27 = vpop.f32.mrb[3].mxu0 }
 0x111   : > { %342 = vst [vmem:[%s170_s9 + $0x8] sm:$0xff] %v338_v26 }
 0x112   : > { %537 = shalt.err (!%p534_p3)
}
 0x113   : > { %s538_s24 = scalar_lea.hbm %s711_s14, 256  ;;  %s542_s30 = scalar_lea.hbm %s758_s4, 512 }
 0x114   : > { %p539_p4 = scmp.ne.s32.totalorder %s711_s14, %s538_s24  ;;  %p543_p9 = scmp.lt.u32.totalorder %s711_s14, %s758_s4 }
 0x115   : > { %p544_p10 = scmp.lt.u32.totalorder %s542_s30, %s538_s24  ;;  %p546_p12 = scmp.lt.u32.totalorder %s538_s24, %s711_s14 }
 0x116   : > { %p540_p7 = pnand %p539_p4, %p661_p5 }
 0x117   : > { %p545_p11 = por %p544_p10, %p543_p9 }
 0x118   : > { %p541_p8 = pneg %p540_p7 }
 0x119   : > { %p547_p13 = por %p546_p12, %p545_p11 }
 0x11b   : > { %p548_p0 = pnand %p547_p13, %p541_p8 }
 0x11d   : > { %551 = shalt.err (!%p548_p0)
}
 0x11e   : > { %s591_s7 = smov 128   ;;  %s592_s8 = smov 8  }
 0x11f   : > { %472 = dma.vmem_to_hbm [thread:$0]  (%p661_p5), %s706_s10, 256, %s711_s14, %s713_s15, %s591_s7, %s591_s7, %s592_s8  }
 0x120 PF: > { %p478_p1 = scmp.ge.s32.totalorder %s586_s20, 2  ;;  %s372_s9 = sand.u32 1, %s574_s17  }
 0x121   : > { %s373_s11 = scalar_lea.sflag [#allocation8], %s372_s9 }
 0x122   : > { %p475_p2 = pnand %p478_p1, %p665_p6 }
 0x124   : > { %569 = dma.done.wait (!%p475_p2), %s373_s11, 256  }
 0x125   : > { %571 = vsyncadd (!%p475_p2), %s373_s11, 4294967040  ;;  %p19_p3 = scmp.ge.s32.totalorder %s648_s22, 4   ;;  %s761_s17 = smov %s578_s18 }
 0x126   : > { %s762_s18 = smov %s582_s19  ;;  %s763_s19 = smov %s659_s25 }
 0x127   : > { %s764_s20 = smov %s648_s22  ;;  %21 = sbr.rel (!%p19_p3) target bundleno = 6 (0x6), region = 69 }
 0x12e   :  { %378 = vsyncpa [#allocation8], 1 }
 0x12f   :  { %380 = vsyncpa [#allocation8 + $0x1], 1 }

</bundles_post_ra>
